<compile_context>
chip_gen: v5e
topology: v5e:2x2
jax: 0.10.0
libtpu: 0.0.40
codegen_flags: <defaults>
</compile_context>

<pallas_src>
import functools

import jax
import jax.numpy as jnp
from jax.experimental import pallas as pl
from jax.experimental.pallas import tpu as pltpu

CHAR_EPS = 1e-3
CHUNK_ROWS = 512   # strip size inside a block: (512,128) f32 temporaries = 256 KiB

# (name, weight, freq, start) -- stands in for the List[DictConfig] of __init__.
LOSS_SPECS = [
    ("mse", 1.0, 1, 0),
    ("l1", 0.5, 2, 0),
    ("charbonnier", 0.25, 1, 5),
]


def _cdiv(a: int, b: int) -> int:
    return -(-a // b)


def _round_up(x: int, m: int) -> int:
    return _cdiv(x, m) * m


def _sublane_multiple(dtype) -> int:
    # (8,128) tiling for 4-byte dtypes, (16,128) for bf16/f16, (32,128) for 1-byte.
    return max(8, 32 // jnp.dtype(dtype).itemsize)


@functools.lru_cache(maxsize=1)
def _chip_config():
    """Returns (num TensorCores to shard over, target bytes per input block)."""
    try:
        kind = jax.devices()[0].device_kind.lower()
    except Exception:  # pragma: no cover - defensive
        kind = ""
    if "v7" in kind:
        # 2 TCs/chip; 2 inputs x 2 bufs x 4 MiB = 16 MiB, inside the 32 MiB scoped default.
        return 2, 4 * 1024 * 1024
    if "v5" in kind:
        # Single TC, 16 MiB scoped-VMEM default: 2 MiB blocks -> 8 MiB footprint.
        return 1, 2 * 1024 * 1024
    # v6e and similar single-TC chips with a 32 MiB scoped default.
    return 1, 4 * 1024 * 1024


def _multi_loss_kernel(pred_ref, tgt_ref, out_ref, acc_sq, acc_abs, acc_char,
                       *, inner_axis: int, blk_rows: int):
    """Accumulates partial SUMS of diff^2, |diff|, sqrt(diff^2+eps^2) into
    vreg-shaped (8,128) scratch; writes a lane-dense (3,8,128) slab at the last
    inner step.  The block is strip-mined so intermediates stay small."""
    i = pl.program_id(inner_axis)

    @pl.when(i == 0)
    def _():
        acc_sq[...] = jnp.zeros_like(acc_sq)
        acc_abs[...] = jnp.zeros_like(acc_abs)
        acc_char[...] = jnp.zeros_like(acc_char)

    # Static (fully unrolled) strip loop: each strip's temporaries are at most
    # (CHUNK_ROWS,128) f32, so the elementwise chain does not flood VMEM with
    # blk-sized temporaries.  The reshape(-1,8,128)+sum(axis=0) fold is
    # layout-preserving (splits the sublane axis along vreg tiles) => pure VALU adds.
    for start in range(0, blk_rows, CHUNK_ROWS):
        size = min(CHUNK_ROWS, blk_rows - start)
        p = pred_ref[pl.ds(start, size), :].astype(jnp.float32)
        t = tgt_ref[pl.ds(start, size), :].astype(jnp.float32)
        diff = p - t
        sq = diff * diff
        acc_sq[...] += jnp.sum(sq.reshape(-1, 8, 128), axis=0)
        acc_abs[...] += jnp.sum(jnp.abs(diff).reshape(-1, 8, 128), axis=0)
        acc_char[...] += jnp.sum(
            jnp.sqrt(sq + CHAR_EPS * CHAR_EPS).reshape(-1, 8, 128), axis=0)

    @pl.when(i == pl.num_programs(inner_axis) - 1)
    def _():
        out_ref[0] = acc_sq[...]
        out_ref[1] = acc_abs[...]
        out_ref[2] = acc_char[...]


@functools.lru_cache(maxsize=None)
def _build_pallas_fn(rows: int, dtype_str: str):
    """Returns (pallas callable, padded_rows) for a (rows,128)-shaped problem."""
    dtype = jnp.dtype(dtype_str)
    sub = _sublane_multiple(dtype)
    cores, block_bytes = _chip_config()

    # Block cap in rows for ~constant bytes per block, aligned to the sublane tile.
    blk_cap = max(sub, (block_bytes // (128 * dtype.itemsize)) // sub * sub)

    rows_per_core = _cdiv(rows, cores)
    inner = max(1, _cdiv(rows_per_core, blk_cap))
    blk = _round_up(_cdiv(rows_per_core, inner), sub)      # <= blk_cap by construction
    padded_rows = cores * inner * blk

    kernel = functools.partial(
        _multi_loss_kernel,
        inner_axis=1 if cores > 1 else 0,
        blk_rows=blk)

    scratch = [pltpu.VMEM((8, 128), jnp.float32)] * 3

    if cores > 1:
        grid = (cores, inner)
        in_specs = [pl.BlockSpec((blk, 128), lambda c, i: (c * inner + i, 0))] * 2
        out_specs = pl.BlockSpec((None, 3, 8, 128), lambda c, i: (c, 0, 0, 0))
        out_shape = jax.ShapeDtypeStruct((cores, 3, 8, 128), jnp.float32)
        # CORE_PARALLEL actually splits the leading axis across v7x's 2 TCs.
        dim_sem = (getattr(pltpu, "CORE_PARALLEL", "parallel"),
                   getattr(pltpu, "ARBITRARY", "arbitrary"))
    else:
        grid = (inner,)
        in_specs = [pl.BlockSpec((blk, 128), lambda i: (i, 0))] * 2
        out_specs = pl.BlockSpec((3, 8, 128), lambda i: (0, 0, 0))
        out_shape = jax.ShapeDtypeStruct((3, 8, 128), jnp.float32)
        dim_sem = ("arbitrary",)

    fn = pl.pallas_call(
        kernel,
        grid_spec=pltpu.PrefetchScalarGridSpec(
            num_scalar_prefetch=0,
            grid=grid,
            in_specs=in_specs,
            out_specs=out_specs,
            scratch_shapes=scratch),
        out_shape=out_shape,
        compiler_params=pltpu.CompilerParams(dimension_semantics=dim_sem),
    )
    return fn, padded_rows


def multi_loss(iteration: int, pred, target):
    """Pallas equivalent of MultiLoss.forward(iteration, pred=..., target=...)."""
    assert pred.dtype == target.dtype, "pred/target dtype must match"
    n = pred.size
    assert n == target.size and n > 0, "pred/target must have the same nonzero size"

    rows = _cdiv(n, 128)
    fn, padded_rows = _build_pallas_fn(int(rows), str(pred.dtype))

    padded_n = padded_rows * 128
    pad = padded_n - n
    flat_p = pred.reshape(-1)
    flat_t = target.reshape(-1)
    if pad:
        # TODO(synk): an in-kernel ragged-tail mask would avoid this extra HBM pass.
        flat_p = jnp.pad(flat_p, (0, pad))
        flat_t = jnp.pad(flat_t, (0, pad))
    p2 = flat_p.reshape(padded_rows, 128)
    t2 = flat_t.reshape(padded_rows, 128)

    partials = fn(p2, t2)                                   # (3,8,128) or (cores,3,8,128)

    # Tiny XLA epilogue: fold per-core vreg partials -> per-loss sums -> means.
    sums = jnp.sum(partials.reshape(-1, 3, 8, 128), axis=(0, 2, 3))  # (3,)
    sum_sq, sum_abs, sum_char = sums[0], sums[1], sums[2]
    if pad:
        # Each zero-padded element contributes sqrt(eps^2) to the charbonnier sum;
        # mse / l1 get exact zeros and need no correction.
        sum_char = sum_char - jnp.float32(pad) * jnp.sqrt(jnp.float32(CHAR_EPS * CHAR_EPS))

    inv_n = jnp.float32(1.0 / n)
    per_loss = {
        "mse": sum_sq * inv_n,
        "l1": sum_abs * inv_n,
        "charbonnier": sum_char * inv_n,
    }

    # Iteration gating + weighted accumulation in Python, exactly as in
    # MultiLoss.forward (iteration is a Python int there too).
    loss_total = jnp.float32(0.0)
    loss_dict = {}
    for name, weight, freq, start in LOSS_SPECS:
        if iteration % freq == 0 and iteration > start:
            loss_dict[name] = per_loss[name]
            loss_total = loss_total + jnp.float32(weight) * per_loss[name]
    return loss_total, loss_dict


def _reference_multi_loss(iteration, pred, target):
    diff = pred.astype(jnp.float32) - target.astype(jnp.float32)
    per = {
        "mse": jnp.mean(diff * diff),
        "l1": jnp.mean(jnp.abs(diff)),
        "charbonnier": jnp.mean(jnp.sqrt(diff * diff + CHAR_EPS * CHAR_EPS)),
    }
    total = jnp.float32(0.0)
    loss_dict = {}
    for name, weight, freq, start in LOSS_SPECS:
        if iteration % freq == 0 and iteration > start:
            loss_dict[name] = per[name]
            total = total + weight * per[name]
    return total, loss_dict


if __name__ == "__main__":
    key = jax.random.PRNGKey(0)
    k1, k2 = jax.random.split(key)
    # NCHW, matching the PyTorch convention.
    pred = jax.random.normal(k1, (2, 4, 16, 16), jnp.float32)
    target = jax.random.normal(k2, (2, 4, 16, 16), jnp.float32)

    ok = True
    for iteration in (3, 6):  # exercise both gated-off and gated-on paths
        total, loss_dict = multi_loss(iteration, pred, target)
        total = jax.block_until_ready(total)
        ref_total, ref_dict = _reference_multi_loss(iteration, pred, target)

        ok &= bool(jnp.allclose(total, ref_total, rtol=1e-5, atol=1e-6))
        ok &= set(loss_dict.keys()) == set(ref_dict.keys())
        for name in ref_dict:
            ok &= bool(jnp.allclose(loss_dict[name], ref_dict[name], rtol=1e-5, atol=1e-6))

    if ok:
        print("KERNEL_OK")
    else:
        print("MISMATCH")
</pallas_src>

<mosaic_0001>
module attributes {stable_mosaic.version = 11 : i64} {
  func.func @_multi_loss_kernel(%arg0: i32, %arg1: memref<16x128xf32, #tpu.memory_space<vmem>>, %arg2: memref<16x128xf32, #tpu.memory_space<vmem>>, %arg3: memref<3x8x128xf32, #tpu.memory_space<vmem>>, %arg4: memref<8x128xf32, #tpu.memory_space<vmem>>, %arg5: memref<8x128xf32, #tpu.memory_space<vmem>>, %arg6: memref<8x128xf32, #tpu.memory_space<vmem>>) attributes {dimension_semantics = [#tpu.dimension_semantics<arbitrary>], iteration_bounds = array<i64: 1>, scalar_prefetch = 0 : i64, scratch_operands = 3 : i64, tpu.core_type = #tpu.core_type<tc>, window_params = [{transform_indices = @transform_0, window_bounds = array<i64: 16, 128>}, {transform_indices = @transform_1, window_bounds = array<i64: 16, 128>}, {pipeline_mode = #tpu.pipeline_mode<synchronous>, transform_indices = @transform_2, window_bounds = array<i64: 3, 8, 128>}]} {
    %c0_i32 = arith.constant 0 : i32
    %0 = arith.cmpi eq, %arg0, %c0_i32 : i32
    %1 = arith.extui %0 : i1 to i32
    %c0_i32_0 = arith.constant 0 : i32
    %2 = arith.cmpi ne, %1, %c0_i32_0 : i32
    scf.if %2 {
      %cst_21 = arith.constant 0.000000e+00 : f32
      %29 = vector.broadcast %cst_21 : f32 to vector<8x128xf32>
      %c0_22 = arith.constant 0 : index
      %c0_23 = arith.constant 0 : index
      %30 = vector.load %arg4[%c0_22, %c0_23] : memref<8x128xf32, #tpu.memory_space<vmem>>, vector<8x128xf32>
      tpu.vector_store %arg4[%c0_22, %c0_23], %29 {strides = array<i32>} : memref<8x128xf32, #tpu.memory_space<vmem>>, vector<8x128xf32>,
      %cst_24 = arith.constant 0.000000e+00 : f32
      %31 = vector.broadcast %cst_24 : f32 to vector<8x128xf32>
      %c0_25 = arith.constant 0 : index
      %c0_26 = arith.constant 0 : index
      %32 = vector.load %arg5[%c0_25, %c0_26] : memref<8x128xf32, #tpu.memory_space<vmem>>, vector<8x128xf32>
      tpu.vector_store %arg5[%c0_25, %c0_26], %31 {strides = array<i32>} : memref<8x128xf32, #tpu.memory_space<vmem>>, vector<8x128xf32>,
      %cst_27 = arith.constant 0.000000e+00 : f32
      %33 = vector.broadcast %cst_27 : f32 to vector<8x128xf32>
      %c0_28 = arith.constant 0 : index
      %c0_29 = arith.constant 0 : index
      %34 = vector.load %arg6[%c0_28, %c0_29] : memref<8x128xf32, #tpu.memory_space<vmem>>, vector<8x128xf32>
      tpu.vector_store %arg6[%c0_28, %c0_29], %33 {strides = array<i32>} : memref<8x128xf32, #tpu.memory_space<vmem>>, vector<8x128xf32>,
    } else {
    }
    %c0 = arith.constant 0 : index
    %c0_1 = arith.constant 0 : index
    %3 = vector.load %arg1[%c0, %c0_1] : memref<16x128xf32, #tpu.memory_space<vmem>>, vector<16x128xf32>
    %c0_2 = arith.constant 0 : index
    %c0_3 = arith.constant 0 : index
    %4 = vector.load %arg2[%c0_2, %c0_3] : memref<16x128xf32, #tpu.memory_space<vmem>>, vector<16x128xf32>
    %5 = arith.subf %3, %4 : vector<16x128xf32>
    %6 = arith.mulf %5, %5 : vector<16x128xf32>
    %c0_4 = arith.constant 0 : index
    %c0_5 = arith.constant 0 : index
    %7 = vector.load %arg4[%c0_4, %c0_5] : memref<8x128xf32, #tpu.memory_space<vmem>>, vector<8x128xf32>
    %8 = vector.shape_cast %6 : vector<16x128xf32> to vector<2x8x128xf32>
    %cst = arith.constant dense<0.000000e+00> : vector<8x128xf32>
    %9 = vector.multi_reduction <add>, %8, %cst [0] : vector<2x8x128xf32> to vector<8x128xf32>
    %10 = arith.addf %7, %9 : vector<8x128xf32>
    %c0_6 = arith.constant 0 : index
    %c0_7 = arith.constant 0 : index
    %11 = vector.load %arg4[%c0_6, %c0_7] : memref<8x128xf32, #tpu.memory_space<vmem>>, vector<8x128xf32>
    tpu.vector_store %arg4[%c0_6, %c0_7], %10 {strides = array<i32>} : memref<8x128xf32, #tpu.memory_space<vmem>>, vector<8x128xf32>,
    %c0_8 = arith.constant 0 : index
    %c0_9 = arith.constant 0 : index
    %12 = vector.load %arg5[%c0_8, %c0_9] : memref<8x128xf32, #tpu.memory_space<vmem>>, vector<8x128xf32>
    %13 = math.absf %5 : vector<16x128xf32>
    %14 = vector.shape_cast %13 : vector<16x128xf32> to vector<2x8x128xf32>
    %cst_10 = arith.constant dense<0.000000e+00> : vector<8x128xf32>
    %15 = vector.multi_reduction <add>, %14, %cst_10 [0] : vector<2x8x128xf32> to vector<8x128xf32>
    %16 = arith.addf %12, %15 : vector<8x128xf32>
    %c0_11 = arith.constant 0 : index
    %c0_12 = arith.constant 0 : index
    %17 = vector.load %arg5[%c0_11, %c0_12] : memref<8x128xf32, #tpu.memory_space<vmem>>, vector<8x128xf32>
    tpu.vector_store %arg5[%c0_11, %c0_12], %16 {strides = array<i32>} : memref<8x128xf32, #tpu.memory_space<vmem>>, vector<8x128xf32>,
    %c0_13 = arith.constant 0 : index
    %c0_14 = arith.constant 0 : index
    %18 = vector.load %arg6[%c0_13, %c0_14] : memref<8x128xf32, #tpu.memory_space<vmem>>, vector<8x128xf32>
    %cst_15 = arith.constant 9.99999997E-7 : f32
    %19 = vector.broadcast %cst_15 : f32 to vector<16x128xf32>
    %20 = arith.addf %6, %19 : vector<16x128xf32>
    %21 = math.sqrt %20 : vector<16x128xf32>
    %22 = vector.shape_cast %21 : vector<16x128xf32> to vector<2x8x128xf32>
    %cst_16 = arith.constant dense<0.000000e+00> : vector<8x128xf32>
    %23 = vector.multi_reduction <add>, %22, %cst_16 [0] : vector<2x8x128xf32> to vector<8x128xf32>
    %24 = arith.addf %18, %23 : vector<8x128xf32>
    %c0_17 = arith.constant 0 : index
    %c0_18 = arith.constant 0 : index
    %25 = vector.load %arg6[%c0_17, %c0_18] : memref<8x128xf32, #tpu.memory_space<vmem>>, vector<8x128xf32>
    tpu.vector_store %arg6[%c0_17, %c0_18], %24 {strides = array<i32>} : memref<8x128xf32, #tpu.memory_space<vmem>>, vector<8x128xf32>,
    %c0_i32_19 = arith.constant 0 : i32
    %26 = arith.cmpi eq, %arg0, %c0_i32_19 : i32
    %27 = arith.extui %26 : i1 to i32
    %c0_i32_20 = arith.constant 0 : i32
    %28 = arith.cmpi ne, %27, %c0_i32_20 : i32
    scf.if %28 {
      %c0_21 = arith.constant 0 : index
      %c0_22 = arith.constant 0 : index
      %29 = vector.load %arg4[%c0_21, %c0_22] : memref<8x128xf32, #tpu.memory_space<vmem>>, vector<8x128xf32>
      %c0_23 = arith.constant 0 : index
      %c0_24 = arith.constant 0 : index
      %c0_25 = arith.constant 0 : index
      %30 = vector.load %arg3[%c0_23, %c0_24, %c0_25] : memref<3x8x128xf32, #tpu.memory_space<vmem>>, vector<1x8x128xf32>
      %31 = vector.shape_cast %30 : vector<1x8x128xf32> to vector<8x128xf32>
      %32 = vector.shape_cast %29 : vector<8x128xf32> to vector<1x8x128xf32>
      tpu.vector_store %arg3[%c0_23, %c0_24, %c0_25], %32 {strides = array<i32>} : memref<3x8x128xf32, #tpu.memory_space<vmem>>, vector<1x8x128xf32>,
      %c0_26 = arith.constant 0 : index
      %c0_27 = arith.constant 0 : index
      %33 = vector.load %arg5[%c0_26, %c0_27] : memref<8x128xf32, #tpu.memory_space<vmem>>, vector<8x128xf32>
      %c1 = arith.constant 1 : index
      %c0_28 = arith.constant 0 : index
      %c0_29 = arith.constant 0 : index
      %34 = vector.load %arg3[%c1, %c0_28, %c0_29] : memref<3x8x128xf32, #tpu.memory_space<vmem>>, vector<1x8x128xf32>
      %35 = vector.shape_cast %34 : vector<1x8x128xf32> to vector<8x128xf32>
      %36 = vector.shape_cast %33 : vector<8x128xf32> to vector<1x8x128xf32>
      tpu.vector_store %arg3[%c1, %c0_28, %c0_29], %36 {strides = array<i32>} : memref<3x8x128xf32, #tpu.memory_space<vmem>>, vector<1x8x128xf32>,
      %c0_30 = arith.constant 0 : index
      %c0_31 = arith.constant 0 : index
      %37 = vector.load %arg6[%c0_30, %c0_31] : memref<8x128xf32, #tpu.memory_space<vmem>>, vector<8x128xf32>
      %c2 = arith.constant 2 : index
      %c0_32 = arith.constant 0 : index
      %c0_33 = arith.constant 0 : index
      %38 = vector.load %arg3[%c2, %c0_32, %c0_33] : memref<3x8x128xf32, #tpu.memory_space<vmem>>, vector<1x8x128xf32>
      %39 = vector.shape_cast %38 : vector<1x8x128xf32> to vector<8x128xf32>
      %40 = vector.shape_cast %37 : vector<8x128xf32> to vector<1x8x128xf32>
      tpu.vector_store %arg3[%c2, %c0_32, %c0_33], %40 {strides = array<i32>} : memref<3x8x128xf32, #tpu.memory_space<vmem>>, vector<1x8x128xf32>,
    } else {
    }
    return
  }
  func.func @transform_0(%arg0: i32) -> (i32, i32) {
    %c0_i32 = arith.constant 0 : i32
    %c0_i32_0 = arith.constant 0 : i32
    return %arg0, %c0_i32 : i32, i32
  }
  func.func @transform_1(%arg0: i32) -> (i32, i32) {
    %c0_i32 = arith.constant 0 : i32
    %c0_i32_0 = arith.constant 0 : i32
    return %arg0, %c0_i32 : i32, i32
  }
  func.func @transform_2(%arg0: i32) -> (i32, i32, i32) {
    %c0_i32 = arith.constant 0 : i32
    %c0_i32_0 = arith.constant 0 : i32
    %c0_i32_1 = arith.constant 0 : i32
    %c0_i32_2 = arith.constant 0 : i32
    return %c0_i32, %c0_i32_0, %c0_i32_1 : i32, i32, i32
  }
}

</mosaic_0001>

<bundles_post_ra>
// kernel: tpu_custom_call.1
= control target key start
LH: loop header
LB: loop body
LE: loop exit
PB: predicated region body
PF: predicated region fallthrough
CT: control target
= control target key end

     0   :  { %7 = vsyncpa [#allocation6], 0  ;;  %s255_s0 = inlined_call_operand.hbm [shape: f32[16,128], index: 0, kind: input, shape index: {}]   ;;  %s256_s1 = inlined_call_operand.hbm [shape: f32[16,128], index: 1, kind: input, shape index: {}]   ;;  %s257_s2 = inlined_call_operand.hbm [shape: f32[3,8,128], index: 2, kind: output, shape index: {}]  }
   0x1   :  { %8 = vsyncpa [#allocation9], 0 }
   0x2   :  { %9 = vsyncpa [#allocation7], 0  ;;  %s14_s11 = sshll.u32 %s255_s0, 4  ;;  %s217_s12 = smov [#allocation5]   ;;  %s15_s11 = int_to_ptr.hbm [resolvable:$true] %s14_s11 }
   0x3   :  { %s16_s13 = sshll.u32 %s217_s12, 4  ;;  %s27_s16 = sshll.u32 %s256_s1, 4  ;;  %s17_s13 = int_to_ptr.vmem [resolvable:$true] %s16_s13  ;;  %s28_s16 = int_to_ptr.hbm [resolvable:$true] %s27_s16 }
   0x4   :  { %s218_s17 = smov 128   ;;  %s219_s18 = smov 8  }
   0x5   :  { %22 = dma.hbm_to_vmem [thread:$0]  %s15_s11, 256, %s17_s13, [#allocation6], %s218_s17, %s218_s17, %s219_s18  }
   0x6   :  { %s220_s19 = smov [#allocation8]  }
   0x7   :  { %s29_s20 = sshll.u32 %s220_s19, 4  ;;  %s30_s20 = int_to_ptr.vmem [resolvable:$true] %s29_s20 }
   0x8   :  { %35 = dma.hbm_to_vmem [thread:$0]  %s28_s16, 256, %s30_s20, [#allocation9], %s218_s17, %s218_s17, %s219_s18  }
   0x9   :  { %211 = dma.done.wait [#allocation6], 256  }
   0xa   :  { %212 = vsyncadd [#allocation6], 4294967040 }
   0xb   :  { %213 = dma.done.wait [#allocation9], 256  }
   0xc   :  { %214 = vsyncadd [#allocation9], 4294967040  ;;  %v51_v0 = vld [vmem:[#allocation5] sm:$0xff]  ;;  %v52_v1 = vld [vmem:[#allocation5 + $0x8] sm:$0xff]  ;;  %s221_s0 = smov [#allocation10]   ;;  %s116_s23 = sshll.u32 %s257_s2, 4  ;;  %s117_s23 = int_to_ptr.hbm [resolvable:$true] %s116_s23 }
   0xd   :  { %v53_v2 = vld [vmem:[#allocation8] sm:$0xff]  ;;  %v54_v3 = vld [vmem:[#allocation8 + $0x8] sm:$0xff]  ;;  %s114_s1 = sshll.u32 %s221_s0, 4  ;;  %s115_s1 = int_to_ptr.vmem [resolvable:$true] %s114_s1 }
   0xe   :  { %v55_v4 = vsub.f32 %v51_v0, %v53_v2  ;;  %v56_v5 = vsub.f32 %v52_v1, %v54_v3 }
  0x10   :  { %v57_v6 = vmul.f32 %v55_v4, %v55_v4  ;;  %v64_v7 = vand.u32 2147483647, %v55_v4  ;;  %v58_v8 = vmul.f32 %v56_v5, %v56_v5  ;;  %v65_v9 = vand.u32 2147483647, %v56_v5 }
  0x12   :  { %v70_v10 = vadd.f32 1e-06, %v57_v6  ;;  %v60_v11 = vadd.f32 %v58_v8, %v57_v6  ;;  %v71_v12 = vadd.f32 1e-06, %v58_v8  ;;  %v66_v13 = vadd.f32 %v65_v9, %v64_v7 }
  0x14   :  { %135 = vrsqrt.f32 %v70_v10  ;;  %103 = vst [vmem:[#allocation10] sm:$0xff] %v60_v11  ;;  %vm79_vm0 = vcmp.eq.f32.partialorder %v70_v10, inf  ;;  %v82_v25 = vand.u32 2147483648, %v70_v10  ;;  %vm81_vm1 = vcmp.eq.f32.partialorder %v70_v10, 0.0 }
  0x15   :  { %137 = vrsqrt.f32 %v71_v12  ;;  %106 = vst [vmem:[#allocation10 + $0x8] sm:$0xff] %v66_v13  ;;  %vm91_vm2 = vcmp.eq.f32.partialorder %v71_v12, inf  ;;  %v94_v28 = vand.u32 2147483648, %v71_v12  ;;  %vm93_vm3 = vcmp.eq.f32.partialorder %v71_v12, 0.0 }
  0x1a   :  { %v136_v14 = vpop.eup %135 }
  0x1b   :  { %v138_v15 = vpop.eup %137  ;;  %v73_v16 = vmul.f32 %v136_v14, %v70_v10 }
  0x1c   :  { %v85_v17 = vmul.f32 %v138_v15, %v71_v12 }
  0x1d   :  { %v74_v18 = vmul.f32 %v136_v14, %v73_v16 }
  0x1e   :  { %v86_v19 = vmul.f32 %v138_v15, %v85_v17 }
  0x1f   :  { %v75_v20 = vmul.f32 0.5, %v74_v18 }
  0x20   :  { %v87_v21 = vmul.f32 0.5, %v86_v19 }
  0x21   :  { %v76_v22 = vsub.f32 1.5, %v75_v20 }
  0x22   :  { %v88_v23 = vsub.f32 1.5, %v87_v21 }
  0x23   :  { %v77_v24 = vmul.f32 %v136_v14, %v76_v22 }
  0x24   :  { %v89_v26 = vmul.f32 %v138_v15, %v88_v23 }
  0x25   :  { %v78_v27 = vmul.f32 %v77_v24, %v70_v10 }
  0x26   :  { %v90_v29 = vmul.f32 %v89_v26, %v71_v12 }
  0x27   :  { %v80_v30 = vsel %vm79_vm0, %v70_v10, %v78_v27 }
  0x28   :  { %v83_v31 = vsel %vm81_vm1, %v82_v25, %v80_v30  ;;  %v92_v32 = vsel %vm91_vm2, %v71_v12, %v90_v29 }
  0x29   :  { %v95_v33 = vsel %vm93_vm3, %v94_v28, %v92_v32 }
  0x2a   :  { %v96_v34 = vadd.f32 %v95_v33, %v83_v31 }
  0x2c   :  { %109 = vst [vmem:[#allocation10 + $0x10] sm:$0xff] %v96_v34 }
  0x2d   :  { %122 = dma.vmem_to_hbm [thread:$0]  %s115_s1, 384, %s117_s23, [#allocation7], %s218_s17, %s218_s17, %s219_s18  }
  0x2e   :  { %215 = dma.done.wait [#allocation7], 384  }
  0x2f   :  { %216 = vsyncadd [#allocation7], 4294966912 }
  0x30   :  { %127 = vsyncpa [#allocation6], 1 }
  0x31   :  { %128 = vsyncpa [#allocation9], 1 }
  0x32   :  { %129 = vsyncpa [#allocation7], 1 }

</bundles_post_ra>
